<compile_context>
chip_gen: v7x
topology: tpu7x:2x2x1
jax: 0.10.0
libtpu: 0.0.40
codegen_flags: <defaults>
</compile_context>

<pallas_src>
import math
from functools import partial

import numpy as np
import jax
import jax.numpy as jnp
from jax.experimental import pallas as pl
from jax.experimental.pallas import tpu as pltpu

LEAKY_SLOPE = 0.2
LEAKY_GAIN = math.sqrt(2.0)

# Keep resident weight bytes comfortably under v7x's 64 MiB / TC VMEM.
_WEIGHT_VMEM_BUDGET = 24 << 20


def _leaky(x):
    # slope in (0,1)  =>  leaky_relu(x) == max(x, slope*x): one vmax, no select.
    return jnp.maximum(x, LEAKY_SLOPE * x)


def _mlp_kernel(x_ref, w1_ref, w2_ref, o_ref, h_ref, *, activate_output):
    # Grid: (batch-tile i, output-feature-tile j); j is the inner axis.
    # The hidden activation depends only on i, so compute it once per batch
    # tile (at j == 0) into a VMEM scratch and reuse it for every output tile.
    @pl.when(pl.program_id(1) == 0)
    def _():
        h = jnp.dot(x_ref[...], w1_ref[...],
                    preferred_element_type=jnp.float32)
        # sqrt(2) gain for layer 1 is already folded into w1 wrapper-side.
        h_ref[...] = _leaky(h).astype(h_ref.dtype)

    y = jnp.dot(h_ref[...], w2_ref[...], preferred_element_type=jnp.float32)
    if activate_output:
        # Output-activation gain is folded into w2 wrapper-side.
        y = _leaky(y)
    o_ref[...] = y.astype(o_ref.dtype)


def _pick_batch_tile(n):
    # Big tiles (>=128 rows) amortize the per-step grid overhead on single-TC
    # v5e/v6e; >=2 grid steps keep both v7x TensorCores busy; a tile that
    # divides N avoids a wrapper-side jnp.pad (full extra HBM copy) of x.
    for t in (512, 256, 128):
        if n % t == 0 and n // t >= 2:
            return t
    if n <= 128:
        return max(8, pl.cdiv(n, 8) * 8)                   # one small tile
    if n <= 1024:
        return max(128, pl.cdiv(pl.cdiv(n, 2), 8) * 8)     # ~2 tiles, tiny pad
    return 512                                             # large ragged batch


def _pick_out_tile(out_pad, hidden_pad, in_dim, itemsize):
    # Largest output-feature tile (multiple of 128 dividing out_pad) such that
    # the resident weights (w1 + buffered w2 tile) fit the VMEM budget.
    w1_bytes = in_dim * hidden_pad * itemsize
    n_lanes = out_pad // 128
    for k in range(n_lanes, 0, -1):
        if n_lanes % k:
            continue
        t = k * 128
        bufs = 1 if t == out_pad else 2      # tiled w2 gets double-buffered
        if w1_bytes + bufs * hidden_pad * t * itemsize <= _WEIGHT_VMEM_BUDGET:
            return t
    return 128
    # TODO(synk): if in_dim * hidden_pad alone exceeds the budget (huge MLPs),
    # add a K grid axis over in_dim with an f32 accumulator (pl.when init/fin).


def multi_layer_perceptron(x, w1, w2, activate_output, *,
                           batch_tile=None, out_tile=None, use_bf16=True):
    """Forward pass of R3GAN MultiLayerPerceptron.

    x:  [N, InputDimension]
    w1: [HiddenDimension, InputDimension]   (PyTorch Linear layout, no bias)
    w2: [OutputDimension, HiddenDimension]
    """
    n, in_dim = x.shape
    hidden, in_dim_w = w1.shape
    out_dim, hidden_w = w2.shape
    assert in_dim == in_dim_w and hidden == hidden_w

    out_dtype = x.dtype
    compute_dtype = jnp.bfloat16 if use_bf16 else x.dtype
    itemsize = jnp.dtype(compute_dtype).itemsize
    out_itemsize = jnp.dtype(out_dtype).itemsize

    # ---- grid-invariant weight prep (wrapper-side, f32, once per call) ----
    # Center per output unit, fold the sqrt(2) activation gain, transpose to
    # [in, out] so matmul outputs are lane-dense.
    w1t = LEAKY_GAIN * (w1 - jnp.mean(w1, axis=1, keepdims=True)).T  # [in, hid]
    w2t = (w2 - jnp.mean(w2, axis=1, keepdims=True)).T               # [hid, out]
    if activate_output:
        w2t = LEAKY_GAIN * w2t
    w1t = w1t.astype(compute_dtype)
    w2t = w2t.astype(compute_dtype)

    # Pad hidden / output feature dims to lane-dense multiples of 128.  Costs
    # only weight bytes (not x traffic) and is numerically exact.
    hidden_pad = pl.cdiv(hidden, 128) * 128
    out_pad = pl.cdiv(out_dim, 128) * 128
    if hidden_pad != hidden:
        w1t = jnp.pad(w1t, ((0, 0), (0, hidden_pad - hidden)))
        w2t = jnp.pad(w2t, ((0, hidden_pad - hidden), (0, 0)))
    if out_pad != out_dim:
        w2t = jnp.pad(w2t, ((0, 0), (0, out_pad - out_dim)))

    # ---- tiling ----
    if batch_tile is None:
        batch_tile = _pick_batch_tile(n)
    n_pad = pl.cdiv(n, batch_tile) * batch_tile
    xk = x.astype(compute_dtype)
    if n_pad != n:
        xk = jnp.pad(xk, ((0, n_pad - n), (0, 0)))

    if out_tile is None:
        out_tile = _pick_out_tile(out_pad, hidden_pad, in_dim, itemsize)
    assert out_tile % 128 == 0 and out_pad % out_tile == 0

    n_steps = n_pad // batch_tile
    out_steps = out_pad // out_tile

    # Constant-index blocks are single-buffered (saves VMEM); w2 only gets the
    # default double-buffering when it is actually tiled over output features.
    w1_spec = pl.BlockSpec((in_dim, hidden_pad), lambda i, j: (0, 0),
                           pipeline_mode=pl.Buffered(1))
    if out_steps == 1:
        w2_spec = pl.BlockSpec((hidden_pad, out_tile), lambda i, j: (0, j),
                               pipeline_mode=pl.Buffered(1))
    else:
        w2_spec = pl.BlockSpec((hidden_pad, out_tile), lambda i, j: (0, j))

    # VMEM cap from the actual footprint + headroom, <=48 MiB so the schedule
    # also keeps headroom on v7x's 64 MiB/TC (v5e/v6e have 128 MiB).
    footprint = (2 * batch_tile * in_dim * itemsize              # x tile x2
                 + in_dim * hidden_pad * itemsize                # w1 (single)
                 + (1 if out_steps == 1 else 2) * hidden_pad * out_tile * itemsize
                 + 2 * batch_tile * out_tile * out_itemsize      # out tile x2
                 + batch_tile * hidden_pad * itemsize)           # h scratch
    vmem_limit = int(min(48 << 20, max(32 << 20, footprint + (8 << 20))))

    out = pl.pallas_call(
        partial(_mlp_kernel, activate_output=activate_output),
        out_shape=jax.ShapeDtypeStruct((n_pad, out_pad), out_dtype),
        grid_spec=pltpu.PrefetchScalarGridSpec(
            num_scalar_prefetch=0,
            grid=(n_steps, out_steps),
            in_specs=[
                pl.BlockSpec((batch_tile, in_dim), lambda i, j: (i, 0)),
                w1_spec,
                w2_spec,
            ],
            out_specs=pl.BlockSpec((batch_tile, out_tile), lambda i, j: (i, j)),
            scratch_shapes=[pltpu.VMEM((batch_tile, hidden_pad), compute_dtype)],
        ),
        compiler_params=pltpu.CompilerParams(
            dimension_semantics=("parallel", "arbitrary"),
            vmem_limit_bytes=vmem_limit,
        ),
    )(xk, w1t, w2t)

    return out[:n, :out_dim]


def _msr_init(key, out_dim, in_dim, activation_gain=1.0):
    # MSRInitializer: N(0, gain / sqrt(fan_in)) for weight of shape [out, in].
    std = activation_gain / math.sqrt(in_dim)
    return std * jax.random.normal(key, (out_dim, in_dim), dtype=jnp.float32)


def _reference_mlp(x, w1, w2, activate_output):
    # Independent float64 numpy reference with the original (unfolded) math.
    x = np.asarray(x, dtype=np.float64)
    w1 = np.asarray(w1, dtype=np.float64)
    w2 = np.asarray(w2, dtype=np.float64)

    def act(z):
        return np.where(z >= 0, z, LEAKY_SLOPE * z) * LEAKY_GAIN

    w1c = w1 - w1.mean(axis=1, keepdims=True)
    w2c = w2 - w2.mean(axis=1, keepdims=True)
    h = act(x @ w1c.T)
    y = h @ w2c.T
    return act(y) if activate_output else y


if __name__ == "__main__":
    # Small shapes implied by the module: x is [batch, InputDimension].
    # batch=256 -> two 128-row tiles (no x padding), so both v7x TCs get work
    # while v5e/v6e pay only two grid steps.
    batch = 256
    input_dim = 32
    hidden_dim = 64
    output_dim = 48
    activate_output = True

    key = jax.random.PRNGKey(0)
    kx, k1, k2, k3 = jax.random.split(key, 4)

    x = jax.random.normal(kx, (batch, input_dim), dtype=jnp.float32)
    w1 = _msr_init(k1, hidden_dim, input_dim, activation_gain=LEAKY_GAIN)
    w2 = _msr_init(k2, output_dim, hidden_dim, activation_gain=1.0)

    out = jax.block_until_ready(
        multi_layer_perceptron(x, w1, w2, activate_output))
    ref = _reference_mlp(x, w1, w2, activate_output)
    assert out.shape == (batch, output_dim)
    # bf16 MXU inputs with f32 accumulation -> loose tolerance vs f64 reference.
    assert np.allclose(np.asarray(out, dtype=np.float64), ref,
                       atol=7e-2, rtol=5e-2)

    # Second check: wider output with a forced 128-lane output tile exercises
    # the out_steps > 1 path (h scratch reused across output-feature tiles).
    output_dim2 = 192
    w2b = _msr_init(k3, output_dim2, hidden_dim, activation_gain=1.0)
    out2 = jax.block_until_ready(
        multi_layer_perceptron(x, w1, w2b, activate_output, out_tile=128))
    ref2 = _reference_mlp(x, w1, w2b, activate_output)
    assert out2.shape == (batch, output_dim2)
    assert np.allclose(np.asarray(out2, dtype=np.float64), ref2,
                       atol=7e-2, rtol=5e-2)

    print("KERNEL_OK")
</pallas_src>

<mosaic_0001>
module attributes {stable_mosaic.version = 11 : i64} {
  func.func @_mlp_kernel(%arg0: i32, %arg1: i32, %arg2: memref<128x32xbf16, #tpu.memory_space<vmem>>, %arg3: memref<32x128xbf16, #tpu.memory_space<vmem>>, %arg4: memref<128x128xbf16, #tpu.memory_space<vmem>>, %arg5: memref<128x128xf32, #tpu.memory_space<vmem>>, %arg6: memref<128x128xbf16, #tpu.memory_space<vmem>>) attributes {dimension_semantics = [#tpu.dimension_semantics<parallel>, #tpu.dimension_semantics<arbitrary>], iteration_bounds = array<i64: 2, 1>, scalar_prefetch = 0 : i64, scratch_operands = 1 : i64, tpu.core_type = #tpu.core_type<tc>, window_params = [{transform_indices = @transform_0, window_bounds = array<i64: 128, 32>}, {pipeline_mode = #tpu.pipeline_mode<synchronous>, transform_indices = @transform_1, window_bounds = array<i64: 32, 128>}, {pipeline_mode = #tpu.pipeline_mode<synchronous>, transform_indices = @transform_2, window_bounds = array<i64: 128, 128>}, {transform_indices = @transform_3, window_bounds = array<i64: 128, 128>}]} {
    %c0_i32 = arith.constant 0 : i32
    %0 = arith.cmpi eq, %arg1, %c0_i32 : i32
    %1 = arith.extui %0 : i1 to i32
    %c0_i32_0 = arith.constant 0 : i32
    %2 = arith.cmpi ne, %1, %c0_i32_0 : i32
    scf.if %2 {
      %c0_7 = arith.constant 0 : index
      %c0_8 = arith.constant 0 : index
      %10 = vector.load %arg2[%c0_7, %c0_8] : memref<128x32xbf16, #tpu.memory_space<vmem>>, vector<128x32xbf16>
      %c0_9 = arith.constant 0 : index
      %c0_10 = arith.constant 0 : index
      %11 = vector.load %arg3[%c0_9, %c0_10] : memref<32x128xbf16, #tpu.memory_space<vmem>>, vector<32x128xbf16>
      %cst_11 = arith.constant dense<0.000000e+00> : vector<128x128xf32>
      %12 = tpu.matmul %10, %11, %cst_11 {dimension_numbers = #tpu.dot_dimension_numbers<[1], [0], [0], [1], [0, 0, 1, 1], [], []>} : vector<128x32xbf16>, vector<32x128xbf16>, vector<128x128xf32> -> vector<128x128xf32>
      %cst_12 = arith.constant 2.000000e-01 : f32
      %13 = vector.broadcast %cst_12 : f32 to vector<128x128xf32>
      %14 = arith.mulf %13, %12 : vector<128x128xf32>
      %15 = arith.maximumf %12, %14 : vector<128x128xf32>
      %16 = arith.truncf %15 : vector<128x128xf32> to vector<128x128xbf16>
      %c0_13 = arith.constant 0 : index
      %c0_14 = arith.constant 0 : index
      %17 = vector.load %arg6[%c0_13, %c0_14] : memref<128x128xbf16, #tpu.memory_space<vmem>>, vector<128x128xbf16>
      tpu.vector_store %arg6[%c0_13, %c0_14], %16 {strides = array<i32>} : memref<128x128xbf16, #tpu.memory_space<vmem>>, vector<128x128xbf16>,
    } else {
    }
    %c0 = arith.constant 0 : index
    %c0_1 = arith.constant 0 : index
    %3 = vector.load %arg6[%c0, %c0_1] : memref<128x128xbf16, #tpu.memory_space<vmem>>, vector<128x128xbf16>
    %c0_2 = arith.constant 0 : index
    %c0_3 = arith.constant 0 : index
    %4 = vector.load %arg4[%c0_2, %c0_3] : memref<128x128xbf16, #tpu.memory_space<vmem>>, vector<128x128xbf16>
    %cst = arith.constant dense<0.000000e+00> : vector<128x128xf32>
    %5 = tpu.matmul %3, %4, %cst {dimension_numbers = #tpu.dot_dimension_numbers<[1], [0], [0], [1], [0, 0, 1, 1], [], []>} : vector<128x128xbf16>, vector<128x128xbf16>, vector<128x128xf32> -> vector<128x128xf32>
    %cst_4 = arith.constant 2.000000e-01 : f32
    %6 = vector.broadcast %cst_4 : f32 to vector<128x128xf32>
    %7 = arith.mulf %6, %5 : vector<128x128xf32>
    %8 = arith.maximumf %5, %7 : vector<128x128xf32>
    %c0_5 = arith.constant 0 : index
    %c0_6 = arith.constant 0 : index
    %9 = vector.load %arg5[%c0_5, %c0_6] : memref<128x128xf32, #tpu.memory_space<vmem>>, vector<128x128xf32>
    tpu.vector_store %arg5[%c0_5, %c0_6], %8 {strides = array<i32>} : memref<128x128xf32, #tpu.memory_space<vmem>>, vector<128x128xf32>,
    return
  }
  func.func @transform_0(%arg0: i32, %arg1: i32) -> (i32, i32) {
    %c0_i32 = arith.constant 0 : i32
    %c0_i32_0 = arith.constant 0 : i32
    return %arg0, %c0_i32 : i32, i32
  }
  func.func @transform_1(%arg0: i32, %arg1: i32) -> (i32, i32) {
    %c0_i32 = arith.constant 0 : i32
    %c0_i32_0 = arith.constant 0 : i32
    %c0_i32_1 = arith.constant 0 : i32
    return %c0_i32, %c0_i32_0 : i32, i32
  }
  func.func @transform_2(%arg0: i32, %arg1: i32) -> (i32, i32) {
    %c0_i32 = arith.constant 0 : i32
    %c0_i32_0 = arith.constant 0 : i32
    return %c0_i32, %arg1 : i32, i32
  }
  func.func @transform_3(%arg0: i32, %arg1: i32) -> (i32, i32) {
    %c0_i32 = arith.constant 0 : i32
    return %arg0, %arg1 : i32, i32
  }
}

</mosaic_0001>

<bundles_post_ra>
// kernel: tpu_custom_call.1
= control target key start
LH: loop header
LB: loop body
LE: loop exit
PB: predicated region body
PF: predicated region fallthrough
CT: control target
= control target key end

     0   :  { %8 = vsyncpa [#allocation4], 0  ;;  %s1267_s0 = inlined_call_operand.vmem [shape: bf16[256,32], index: 0, kind: input, shape index: {}]   ;;  %s1268_s1 = inlined_call_operand.vmem [shape: bf16[32,128], index: 1, kind: input, shape index: {}]   ;;  %s1269_s2 = inlined_call_operand.vmem [shape: bf16[128,128], index: 2, kind: input, shape index: {}]   ;;  %s1270_s3 = inlined_call_operand.hbm [shape: f32[256,128], index: 3, kind: output, shape index: {}]  }
   0x1   :  { %10 = vsyncpa [#allocation4 + $0x1], 0  ;;  %s1082_s12 = smov 0   ;;  %s1084_s13 = smov 0  }
   0x2   :  { %s1086_s14 = smov 0   ;;  %s1088_s15 = smov 0  }
   0x3   :  { %s1090_s16 = smov 0   ;;  %s1092_s17 = smov 0  }
   0x4 LB: > { %s769_s18 = sadd.s32 4294967295, %s1057_s17   ;;  %s770_s19 = sadd.s32 4294967294, %s1057_s17   ;;  %s1057_s17 = sphi %s1092_s17, %s16_s17   ;;  %s1053_s16 = sphi %s1090_s16, %s1277_s16   ;;  %s1049_s15 = sphi %s1088_s15, %s1276_s15   ;;  %s1045_s14 = sphi %s1086_s14, %s1275_s14   ;;  %s1041_s13 = sphi %s1084_s13, %s1274_s13   ;;  %s1037_s12 = sphi %s1082_s12, %s1273_s12  }
   0x5   : > { %s28_s20 = sadd.s32 1, %s1053_s16  ;;  %s110_s21 = sadd.s32 1, %s1045_s14 }
   0x6   : > { %p30_p0 = scmp.ge.s32.totalorder %s28_s20, 2  ;;  %p120_p1 = scmp.ne.s32.totalorder %s1045_s14, %s1041_s13 }
   0x7   : > { %p121_p2 = scmp.eq.s32.totalorder %s769_s18, 1  ;;  %p126_p3 = scmp.ne.s32.totalorder %s1041_s13, %s1037_s12 }
   0x8   : > { %s1279_s20 = smov (%p30_p0, %s28_s20), 0  ;;  %p127_p5 = scmp.eq.s32.totalorder %s770_s19, 1 }
   0x9   : > { %p1122_p4 = por %p121_p2, %p120_p1  ;;  %s105_s23 = ssub.s32 %s1053_s16, %s1279_s20 }
   0xa   : > { %p774_p6 = scmp.ge.s32.totalorder %s1057_s17, 1  ;;  %p108_p7 = scmp.eq.s32.totalorder %s105_s23, 0 }
   0xb   : > { %p1129_p8 = por %p127_p5, %p126_p3  ;;  %p164_p9 = scmp.lt.s32.totalorder %s1057_s17, 3 }
   0xc   : > { %s1135_s25 = scalar_select %p108_p7, %s1045_s14, %s110_s21  }
   0xd   : > { %p165_p10 = pnand %p774_p6, %p164_p9 }
   0xe   : > { %v961_v0 = vld [vmem:[%s1268_s1] sm:$0xff] (!%p165_p10)   ;;  %s776_s28 = sshll.u32 (!%p165_p10), %s1049_s15, 4  ;;  %v962_v1 = vld [vmem:[%s1268_s1 + $0x8] sm:$0xff] (!%p165_p10)   ;;  %vm280_vm0 = vcmask (!%p165_p10), 261120   ;;  %v973_v4 = vld [vmem:[%s1269_s2 + $0x10] sm:$0xff] (!%p165_p10)   ;;  %s189_s7 = sand.u32 (!%p165_p10), 1, %s1041_s13  }
   0xf   : > { %168 = sbr.rel (%p165_p10) target bundleno = 507 (0x1fb), region = 32  ;;  %p193_p11 = scmp.lt.s32.totalorder (!%p165_p10), %s776_s28, 31  ;;  %836 = vmatprep.subr.bf16.mxu0 (!%p165_p10), %v961_v0  ;;  %v971_v2 = vld [vmem:[%s1269_s2] sm:$0xff] (!%p165_p10)   ;;  %v972_v3 = vld [vmem:[%s1269_s2 + $0x8] sm:$0xff] (!%p165_p10)   ;;  %v974_v8 = vld [vmem:[%s1269_s2 + $0x18] sm:$0xff] (!%p165_p10)  }
  0x10   : > { %837 = vmatpush3.bf16.msra.mxu0 (!%p165_p10), %v961_v0  ;;  %888 = vmatprep.subr.bf16.mxu1 (!%p165_p10), %v971_v2  ;;  %v975_v10 = vld [vmem:[%s1269_s2 + $0x20] sm:$0xff] (!%p165_p10)   ;;  %v976_v12 = vld [vmem:[%s1269_s2 + $0x28] sm:$0xff] (!%p165_p10)   ;;  %v977_v16 = vld [vmem:[%s1269_s2 + $0x30] sm:$0xff] (!%p165_p10)   ;;  %s809_s10 = sshll.u32 (!%p165_p10), %s1049_s15, 11  ;;  %s1221_s15 = scalar_lea.sflag (!%p165_p10), [#allocation4], %s189_s7 }
  0x11   : > { %838 = vmatprep.subr.bf16.mxu0 (!%p165_p10), %v962_v1  ;;  %896 = vmatpush3.bf16.msra.mxu1 (!%p165_p10), %v971_v2  ;;  %v978_v17 = vld [vmem:[%s1269_s2 + $0x38] sm:$0xff] (!%p165_p10)   ;;  %s1212_s21 = scalar_lea.hbm (!%p165_p10), %s1270_s3, %s809_s10  ;;  %s1059_s26 = smov (!%p165_p10), [#allocation3]  }
  0x12   : > { %889 = vmatprep.subr.bf16.mxu1 (!%p165_p10), %v972_v3  ;;  %s983_s27 = sshll.u32 (!%p165_p10), %s1059_s26, 4  ;;  %s984_s27 = int_to_ptr.vmem [resolvable:$false] %s983_s27 }
  0x14   : > { %839 = vmatpush3.bf16.msra.mxu0 (!%p165_p10), %v962_v1 }
  0x15   : > { %856 = vmatprep.subr.bf16.mxu0 (!%p165_p10), %v971_v2  ;;  %897 = vmatpush3.bf16.msra.mxu1 (!%p165_p10), %v972_v3 }
  0x16   : > { %s1281_s28 = smov (!%p193_p11, %s776_s28), 31  ;;  %890 = vmatprep.subr.bf16.mxu1 %v973_v4 }
  0x17   : > { %s777_s8 = sshll.u32 %s1281_s28, 2  ;;  %s985_s28 = scalar_lea.vmem %s984_s27, 4096 }
  0x18   : > { %s1153_s11 = scalar_lea.vmem %s1267_s0, %s777_s8  ;;  %s775_s8 = sshll.u32 %s189_s7, 7 }
  0x19   : > { %v963_v5 = vld [vmem:[%s1153_s11] sm:$0xff]   ;;  %v964_v6 = vld [vmem:[%s1153_s11 + $0x8] sm:$0xff]   ;;  %v965_v7 = vld [vmem:[%s1153_s11 + $0x10] sm:$0xff]   ;;  %898 = vmatpush3.bf16.msra.mxu1 %v973_v4  ;;  %s1192_s9 = scalar_lea.vmem [#allocation3], %s775_s8 }
  0x1a   : > { %840 = vmatprep.mubr.msk.bf16.mxu0 %vm280_vm0, %v963_v5  ;;  %v966_v9 = vld [vmem:[%s1153_s11 + $0x18] sm:$0xff]   ;;  %891 = vmatprep.subr.bf16.mxu1 %v974_v8  ;;  %v967_v11 = vld [vmem:[%s1153_s11 + $0x20] sm:$0xff]   ;;  %v968_v13 = vld [vmem:[%s1153_s11 + $0x28] sm:$0xff]  }
  0x1b   : > { %841 = vmatmul.mubr.msk.bf16.vlgmr.msra.gmra.mrb[0].mxu0 %vm280_vm0, %v964_v6  ;;  %v969_v14 = vld [vmem:[%s1153_s11 + $0x30] sm:$0xff]   ;;  %v970_v15 = vld [vmem:[%s1153_s11 + $0x38] sm:$0xff]   ;;  %s682_s11 = sshll.u32 %s1192_s9, 4  ;;  %s1214_s11 = int_to_ptr.vmem [resolvable:$true] %s682_s11 }
  0x1c   : > { %844 = vmatprep.mubr.msk.bf16.mxu0 %vm280_vm0, %v965_v7  ;;  %857 = vmatpush3.bf16.msra.mxu0 %v971_v2  ;;  %s979_s23 = scalar_lea.vmem %s1214_s11, 2048  ;;  %p986_p1 = scmp.lt.s32.totalorder %s1214_s11, %s984_s27 }
  0x1d   : > { %858 = vmatprep.subr.bf16.mxu0 %v972_v3  ;;  %899 = vmatpush3.bf16.msra.mxu1 %v974_v8  ;;  %p980_p12 = scmp.ne.s32.totalorder %s1214_s11, %s979_s23  ;;  %p987_p2 = scmp.lt.s32.totalorder %s985_s28, %s979_s23 }
  0x1e   : > { %892 = vmatprep.subr.bf16.mxu1 %v975_v10 }
  0x1f   : > { %p981_p13 = pnand %p980_p12, %p1122_p4  ;;  %p988_p3 = por %p987_p2, %p986_p1 }
  0x20   : > { %859 = vmatpush3.bf16.msra.mxu0 %v972_v3 }
  0x21   : > { %860 = vmatprep.subr.bf16.mxu0 %v973_v4  ;;  %900 = vmatpush3.bf16.msra.mxu1 %v975_v10  ;;  %p982_p0 = pneg %p981_p13 }
  0x22   : > { %893 = vmatprep.subr.bf16.mxu1 %v976_v12 }
  0x23   : > { %845 = vmatmul.mubr.msk.bf16.gmra.mrb[4].mxu0 %vm280_vm0, %v966_v9  ;;  %p989_p5 = pnand %p988_p3, %p982_p0 }
  0x24   : > { %848 = vmatprep.mubr.msk.bf16.mxu0 %vm280_vm0, %v967_v11  ;;  %861 = vmatpush3.bf16.msra.mxu0 %v973_v4 }
  0x25   : > { %862 = vmatprep.subr.bf16.mxu0 %v974_v8  ;;  %901 = vmatpush3.bf16.msra.mxu1 %v976_v12 }
  0x26   : > { %894 = vmatprep.subr.bf16.mxu1 %v977_v16 }
  0x28   : > { %863 = vmatpush3.bf16.msra.mxu0 %v974_v8 }
  0x29   : > { %864 = vmatprep.subr.bf16.mxu0 %v975_v10  ;;  %902 = vmatpush3.bf16.msra.mxu1 %v977_v16 }
  0x2a   : > { %895 = vmatprep.subr.bf16.mxu1 %v978_v17 }
  0x2b   : > { %849 = vmatmul.mubr.msk.bf16.gmra.mrb[8].mxu0 %vm280_vm0, %v968_v13 }
  0x2c   : > { %852 = vmatprep.mubr.msk.bf16.mxu0 %vm280_vm0, %v969_v14  ;;  %865 = vmatpush3.bf16.msra.mxu0 %v975_v10 }
  0x2d   : > { %866 = vmatprep.subr.bf16.mxu0 %v976_v12  ;;  %903 = vmatpush3.bf16.msra.mxu1 %v978_v17 }
  0x30   : > { %867 = vmatpush3.bf16.msra.mxu0 %v976_v12 }
  0x31   : > { %868 = vmatprep.subr.bf16.mxu0 %v977_v16 }
  0x33   : > { %853 = vmatmul.mubr.msk.bf16.gmra.mrb[12].mxu0 %vm280_vm0, %v970_v15 }
  0x34   : > { %869 = vmatpush3.bf16.msra.mxu0 %v977_v16 }
  0x35   : > { %870 = vmatprep.subr.bf16.mxu0 %v978_v17 }
  0x38   : > { %871 = vmatpush3.bf16.msra.mxu0 %v978_v17 }
  0xee   : > { %v842_v18 = vpop.f32.mrb[0].mxu0 }
  0xef   : > { %v404_v19 = vmul.f32 0.2, %v842_v18  ;;  %v339_v20 = vpop.f32.mrb[1].mxu0 }
  0xf0   : > { %v402_v21 = vmul.f32 0.2, %v339_v20  ;;  %v843_v22 = vpop.f32.mrb[2].mxu0 }
  0xf1   : > { %v405_v23 = vmul.f32 0.2, %v843_v22  ;;  %v342_v24 = vpop.f32.mrb[3].mxu0  ;;  %v420_v26 = vmax.f32 %v842_v18, %v404_v19 }
  0xf2   : > { %v403_v25 = vmul.f32 0.2, %v342_v24  ;;  %v418_v28 = vmax.f32 %v339_v20, %v402_v21 }
  0xf3   : > { %v421_v27 = vmax.f32 %v843_v22, %v405_v23 }
  0xf4   : > { %v419_v29 = vmax.f32 %v342_v24, %v403_v25 }
  0xf5   : > { %v435_v30 = vpack.c.bf16 %v421_v27, %v420_v26 }
  0xf6   : > { %v434_v31 = vpack.c.bf16 %v419_v29, %v418_v28  ;;  %v846_v32 = vpop.f32.mrb[4].mxu0 }
  0xf7   : > { %v408_v33 = vmul.f32 0.2, %v846_v32  ;;  %v355_v34 = vpop.f32.mrb[5].mxu0 }
  0xf8   : > { %v406_v35 = vmul.f32 0.2, %v355_v34  ;;  %v847_v36 = vpop.f32.mrb[6].mxu0  ;;  %872 = vmatprep.mubr.bf16.mxu0 %v434_v31 }
  0xf9   : > { %v409_v37 = vmul.f32 0.2, %v847_v36  ;;  %v358_v38 = vpop.f32.mrb[7].mxu0  ;;  %873 = vmatmul.mubr.bf16.vlgmr.msra.gmra.mrb[16].mxu0 %v435_v30  ;;  %v424_v40 = vmax.f32 %v846_v32, %v408_v33 }
  0xfa   : > { %v407_v39 = vmul.f32 0.2, %v358_v38  ;;  %v422_v42 = vmax.f32 %v355_v34, %v406_v35 }
  0xfb   : > { %v425_v41 = vmax.f32 %v847_v36, %v409_v37 }
  0xfc   : > { %v423_v43 = vmax.f32 %v358_v38, %v407_v39 }
  0xfd   : > { %v437_v44 = vpack.c.bf16 %v425_v41, %v424_v40 }
  0xfe   : > { %v850_v45 = vpop.f32.mrb[8].mxu0  ;;  %v436_v46 = vpack.c.bf16 %v423_v43, %v422_v42 }
  0xff   : > { %v412_v47 = vmul.f32 0.2, %v850_v45  ;;  %v371_v48 = vpop.f32.mrb[9].mxu0 }
 0x100   : > { %v410_v49 = vmul.f32 0.2, %v371_v48  ;;  %v851_v50 = vpop.f32.mrb[10].mxu0  ;;  %876 = vmatprep.mubr.bf16.mxu1 %v436_v46 }
 0x101   : > { %v413_v51 = vmul.f32 0.2, %v851_v50  ;;  %v374_v52 = vpop.f32.mrb[11].mxu0  ;;  %877 = vmatmul.mubr.bf16.vlgmr.msra.gmra.mrb[0].mxu1 %v437_v44  ;;  %v428_v54 = vmax.f32 %v850_v45, %v412_v47 }
 0x102   : > { %v411_v53 = vmul.f32 0.2, %v374_v52  ;;  %v426_v56 = vmax.f32 %v371_v48, %v410_v49 }
 0x103   : > { %v429_v55 = vmax.f32 %v851_v50, %v413_v51 }
 0x104   : > { %v427_v57 = vmax.f32 %v374_v52, %v411_v53 }
 0x105   : > { %v439_v58 = vpack.c.bf16 %v429_v55, %v428_v54 }
 0x106   : > { %v438_v59 = vpack.c.bf16 %v427_v57, %v426_v56  ;;  %v854_v60 = vpop.f32.mrb[12].mxu0 }
 0x107   : > { %v416_v61 = vmul.f32 0.2, %v854_v60  ;;  %v387_v62 = vpop.f32.mrb[13].mxu0 }
 0x108   : > { %v414_v63 = vmul.f32 0.2, %v387_v62  ;;  %v855_v0 = vpop.f32.mrb[14].mxu0  ;;  %880 = vmatprep.mubr.bf16.mxu1 %v438_v59 }
 0x109   : > { %v417_v1 = vmul.f32 0.2, %v855_v0  ;;  %v390_v2 = vpop.f32.mrb[15].mxu0  ;;  %881 = vmatmul.mubr.bf16.gmra.mrb[4].mxu1 %v439_v58  ;;  %v432_v4 = vmax.f32 %v854_v60, %v416_v61 }
 0x10a   : > { %v415_v3 = vmul.f32 0.2, %v390_v2  ;;  %v430_v6 = vmax.f32 %v387_v62, %v414_v63 }
 0x10b   : > { %v433_v5 = vmax.f32 %v855_v0, %v417_v1 }
 0x10c   : > { %v431_v7 = vmax.f32 %v390_v2, %v415_v3 }
 0x10d   : > { %v441_v8 = vpack.c.bf16 %v433_v5, %v432_v4 }
 0x10e   : > { %v440_v9 = vpack.c.bf16 %v431_v7, %v430_v6 }
 0x110   : > { %884 = vmatprep.mubr.bf16.mxu1 %v440_v9 }
 0x111   : > { %885 = vmatmul.mubr.bf16.gmra.mrb[8].mxu1 %v441_v8 }
 0x1cc   : > { %v874_v10 = vpop.f32.mrb[16].mxu0 }
 0x1cd   : > { %v621_v11 = vmul.f32 0.2, %v874_v10  ;;  %v556_v12 = vpop.f32.mrb[17].mxu0 }
 0x1ce   : > { %v619_v13 = vmul.f32 0.2, %v556_v12  ;;  %v875_v14 = vpop.f32.mrb[18].mxu0 }
 0x1cf   : > { %v637_v15 = vmax.f32 %v874_v10, %v621_v11  ;;  %v622_v16 = vmul.f32 0.2, %v875_v14  ;;  %v559_v17 = vpop.f32.mrb[19].mxu0 }
 0x1d0   : > { %v635_v18 = vmax.f32 %v556_v12, %v619_v13  ;;  %v620_v19 = vmul.f32 0.2, %v559_v17 }
 0x1d1   : > { %653 = vst [vmem:[%s1192_s9 + $0x10] sm:$0xff] %v637_v15  ;;  %v638_v20 = vmax.f32 %v875_v14, %v622_v16 }
 0x1d2   : > { %651 = vst [vmem:[%s1192_s9] sm:$0xff] %v635_v18  ;;  %v636_v21 = vmax.f32 %v559_v17, %v620_v19 }
 0x1d3   : > { %654 = vst [vmem:[%s1192_s9 + $0x18] sm:$0xff] %v638_v20 }
 0x1d4   : > { %652 = vst [vmem:[%s1192_s9 + $0x8] sm:$0xff] %v636_v21  ;;  %v878_v22 = vpop.f32.mrb[0].mxu1 }
 0x1d5   : > { %v625_v23 = vmul.f32 0.2, %v878_v22  ;;  %v572_v24 = vpop.f32.mrb[1].mxu1 }
 0x1d6   : > { %v623_v25 = vmul.f32 0.2, %v572_v24  ;;  %v879_v26 = vpop.f32.mrb[2].mxu1 }
 0x1d7   : > { %v641_v27 = vmax.f32 %v878_v22, %v625_v23  ;;  %v626_v28 = vmul.f32 0.2, %v879_v26  ;;  %v575_v29 = vpop.f32.mrb[3].mxu1 }
 0x1d8   : > { %v639_v30 = vmax.f32 %v572_v24, %v623_v25  ;;  %v624_v31 = vmul.f32 0.2, %v575_v29 }
 0x1d9   : > { %657 = vst [vmem:[%s1192_s9 + $0x30] sm:$0xff] %v641_v27  ;;  %v642_v32 = vmax.f32 %v879_v26, %v626_v28 }
 0x1da   : > { %655 = vst [vmem:[%s1192_s9 + $0x20] sm:$0xff] %v639_v30  ;;  %v640_v33 = vmax.f32 %v575_v29, %v624_v31 }
 0x1db   : > { %658 = vst [vmem:[%s1192_s9 + $0x38] sm:$0xff] %v642_v32 }
 0x1dc   : > { %656 = vst [vmem:[%s1192_s9 + $0x28] sm:$0xff] %v640_v33  ;;  %v882_v34 = vpop.f32.mrb[4].mxu1 }
 0x1dd   : > { %v629_v35 = vmul.f32 0.2, %v882_v34  ;;  %v588_v36 = vpop.f32.mrb[5].mxu1 }
 0x1de   : > { %v627_v37 = vmul.f32 0.2, %v588_v36  ;;  %v883_v38 = vpop.f32.mrb[6].mxu1 }
 0x1df   : > { %v645_v39 = vmax.f32 %v882_v34, %v629_v35  ;;  %v630_v40 = vmul.f32 0.2, %v883_v38  ;;  %v591_v41 = vpop.f32.mrb[7].mxu1 }
 0x1e0   : > { %v643_v42 = vmax.f32 %v588_v36, %v627_v37  ;;  %v628_v43 = vmul.f32 0.2, %v591_v41 }
 0x1e1   : > { %661 = vst [vmem:[%s1192_s9 + $0x50] sm:$0xff] %v645_v39  ;;  %v646_v44 = vmax.f32 %v883_v38, %v630_v40 }
 0x1e2   : > { %659 = vst [vmem:[%s1192_s9 + $0x40] sm:$0xff] %v643_v42  ;;  %v644_v45 = vmax.f32 %v591_v41, %v628_v43 }
 0x1e3   : > { %662 = vst [vmem:[%s1192_s9 + $0x58] sm:$0xff] %v646_v44 }
 0x1e4   : > { %660 = vst [vmem:[%s1192_s9 + $0x48] sm:$0xff] %v644_v45  ;;  %v886_v46 = vpop.f32.mrb[8].mxu1 }
 0x1e5   : > { %v633_v47 = vmul.f32 0.2, %v886_v46  ;;  %v604_v48 = vpop.f32.mrb[9].mxu1 }
 0x1e6   : > { %v631_v49 = vmul.f32 0.2, %v604_v48  ;;  %v887_v50 = vpop.f32.mrb[10].mxu1 }
 0x1e7   : > { %v649_v51 = vmax.f32 %v886_v46, %v633_v47  ;;  %v634_v52 = vmul.f32 0.2, %v887_v50  ;;  %v607_v53 = vpop.f32.mrb[11].mxu1 }
 0x1e8   : > { %v647_v54 = vmax.f32 %v604_v48, %v631_v49  ;;  %v632_v55 = vmul.f32 0.2, %v607_v53 }
 0x1e9   : > { %665 = vst [vmem:[%s1192_s9 + $0x70] sm:$0xff] %v649_v51  ;;  %v650_v56 = vmax.f32 %v887_v50, %v634_v52 }
 0x1ea   : > { %663 = vst [vmem:[%s1192_s9 + $0x60] sm:$0xff] %v647_v54  ;;  %v648_v57 = vmax.f32 %v607_v53, %v632_v55 }
 0x1eb   : > { %666 = vst [vmem:[%s1192_s9 + $0x78] sm:$0xff] %v650_v56 }
 0x1ec   : > { %664 = vst [vmem:[%s1192_s9 + $0x68] sm:$0xff] %v648_v57 }
 0x1ed   : > { %992 = shalt.err (!%p989_p5)
}
 0x1ee   : > { %s993_s29 = scalar_lea.hbm %s1212_s21, 2048  ;;  %s997_s5 = scalar_lea.hbm %s1270_s3, 4096 }
 0x1ef   : > { %p994_p6 = scmp.ne.s32.totalorder %s1212_s21, %s993_s29  ;;  %p998_p10 = scmp.lt.u32.totalorder %s1212_s21, %s1270_s3 }
 0x1f0   : > { %p999_p11 = scmp.lt.u32.totalorder %s997_s5, %s993_s29  ;;  %p1001_p13 = scmp.lt.u32.totalorder %s993_s29, %s1212_s21 }
 0x1f1   : > { %p995_p7 = pnand %p994_p6, %p1122_p4 }
 0x1f2   : > { %p1000_p12 = por %p999_p11, %p998_p10 }
 0x1f3   : > { %p996_p9 = pneg %p995_p7 }
 0x1f4   : > { %p1002_p0 = por %p1001_p13, %p1000_p12 }
 0x1f6   : > { %p1003_p1 = pnand %p1002_p0, %p996_p9 }
 0x1f8   : > { %1006 = shalt.err (!%p1003_p1)
}
 0x1f9   : > { %s1060_s8 = smov 128   ;;  %s1061_s9 = smov 8  }
 0x1fa   : > { %904 = dma.vmem_to_hbm [thread:$0]  (%p1122_p4), %s1214_s11, 2048, %s1212_s21, %s1221_s15, %s1060_s8, %s1060_s8, %s1061_s9  }
 0x1fb PF: > { %p910_p2 = scmp.ge.s32.totalorder %s1057_s17, 2  ;;  %s697_s10 = sand.u32 1, %s1037_s12  }
 0x1fc   : > { %s698_s18 = scalar_lea.sflag [#allocation4], %s697_s10 }
 0x1fd   : > { %p907_p3 = pnand %p910_p2, %p1129_p8 }
 0x1ff   : > { %1032 = dma.done.wait (!%p907_p3), %s698_s18, 2048  }
 0x200   : > { %1034 = vsyncadd (!%p907_p3), %s698_s18, 4294965248  ;;  %s16_s17 = sadd.s32 1, %s1057_s17   ;;  %s1273_s12 = smov %s1041_s13 }
 0x201   : > { %p13_p5 = scmp.ge.s32.totalorder %s16_s17, 4   ;;  %s1274_s13 = smov %s1045_s14 }
 0x202   : > { %s1275_s14 = smov %s1135_s25  ;;  %s1276_s15 = smov %s1053_s16 }
 0x203   : > { %s1277_s16 = smov %s1279_s20  ;;  %15 = sbr.rel (!%p13_p5) target bundleno = 4 (0x4), region = 74 }
 0x20a   :  { %703 = vsyncpa [#allocation4], 1 }
 0x20b   :  { %705 = vsyncpa [#allocation4 + $0x1], 1 }

</bundles_post_ra>
